<compile_context>
chip_gen: v5e
topology: v5e:2x2
jax: 0.10.0
libtpu: 0.0.40
codegen_flags: <defaults>
</compile_context>

<pallas_src>
import functools

import jax
import jax.numpy as jnp
from jax import lax
from jax.experimental import pallas as pl
from jax.experimental.pallas import tpu as pltpu

_LANE = 128      # lane width (last-dim tile)
_SUBLANE = 8     # f32 sublane width (second-minor tile)


def _round_up(x, m):
    return (x + m - 1) // m * m


def _last_token_index(mask, seq_len):
    """lengths = mask.sum(1) - 1; all-padding rows map to the last position
    (mirrors torch's h[arange(B), -1] behaviour)."""
    raw = jnp.sum(mask.astype(jnp.int32), axis=1) - 1
    return jnp.where(raw < 0, seq_len - 1, raw).astype(jnp.int32)


def _critic_kernel(len_a_ref, len_g_ref,             # scalar prefetch (SMEM)
                   xa_hbm, xg_hbm,                   # activations, HBM (ANY)
                   wa_ref, ba_ref, wg_ref, bg_ref,   # weights resident in VMEM
                   q_ref,                            # (TBR, BC) output tile
                   ga_scr, gg_scr, embg_scr,         # VMEM scratch
                   sem_a, sem_g,                     # DMA semaphores
                   *, n_goal_rows):
    i = pl.program_id(0)
    tbr, _ = ga_scr.shape

    # ---- goal path (grid step 0 only): gather every goal's last-token row,
    #      project with tanh(x @ Wg + bg), keep resident in embg_scr. --------
    @pl.when(i == 0)
    def _():
        gg_scr[...] = jnp.zeros_like(gg_scr)          # zero the padded rows
        copies = [
            pltpu.make_async_copy(
                xg_hbm.at[r, pl.ds(len_g_ref[r], 1), :],
                gg_scr.at[pl.ds(r, 1), :],
                sem_g.at[r])
            for r in range(n_goal_rows)]
        for c in copies:
            c.start()
        for c in copies:
            c.wait()
        embg_scr[...] = jnp.tanh(
            jnp.dot(gg_scr[...].astype(jnp.bfloat16), wg_ref[...],
                    preferred_element_type=jnp.float32) + bg_ref[...])

    # ---- action path: gather this tile's TBR last-token rows. --------------
    copies = [
        pltpu.make_async_copy(
            xa_hbm.at[i * tbr + r, pl.ds(len_a_ref[i * tbr + r], 1), :],
            ga_scr.at[pl.ds(r, 1), :],
            sem_a.at[r])
        for r in range(tbr)]
    for c in copies:
        c.start()
    for c in copies:
        c.wait()

    emb_a = jnp.tanh(
        jnp.dot(ga_scr[...].astype(jnp.bfloat16), wa_ref[...],
                preferred_element_type=jnp.float32) + ba_ref[...])

    # ---- Q tile = emb_action @ emb_goal.T (lane-dense (TBR, BC) store) -----
    q_ref[...] = lax.dot_general(
        emb_a.astype(jnp.bfloat16), embg_scr[...].astype(jnp.bfloat16),
        dimension_numbers=(((1,), (1,)), ((), ())),
        preferred_element_type=jnp.float32)


def contrastive_critic_forward(x_action, mask_action, x_goal, mask_goal,
                               w_a, b_a, w_g, b_g):
    """Q[i, j] = <phi(s_i, a_i), psi(g_j)>, shape (B, B)."""
    B, S, H = x_action.shape
    H_pad = _round_up(H, _LANE)
    TBR = _SUBLANE                       # action rows per grid step (Q-tile rows)
    BR = _round_up(B, TBR)               # padded action rows  -> Q rows
    BC = _round_up(B, _LANE)             # padded goal rows    -> Q lanes

    len_a = jnp.pad(_last_token_index(mask_action, S), (0, BR - B))
    len_g = _last_token_index(mask_goal, S)

    # Zero-pad hidden to the 128-lane width and the action batch to the row
    # tile. Real Qwen2 hidden sizes (e.g. 896) are already 128-aligned, so at
    # realistic shapes these pads are no-ops.
    xa = jnp.pad(x_action, ((0, BR - B), (0, 0), (0, H_pad - H)))
    xg = jnp.pad(x_goal, ((0, 0), (0, 0), (0, H_pad - H)))
    wa = jnp.pad(w_a, ((0, H_pad - H), (0, H_pad - H))).astype(jnp.bfloat16)
    wg = jnp.pad(w_g, ((0, H_pad - H), (0, H_pad - H))).astype(jnp.bfloat16)
    ba = jnp.pad(jnp.reshape(b_a, (1, H)),
                 ((0, 0), (0, H_pad - H))).astype(jnp.float32)
    bg = jnp.pad(jnp.reshape(b_g, (1, H)),
                 ((0, 0), (0, H_pad - H))).astype(jnp.float32)

    grid_spec = pltpu.PrefetchScalarGridSpec(
        num_scalar_prefetch=2,
        grid=(BR // TBR,),
        in_specs=[
            pl.BlockSpec(memory_space=pl.ANY),                       # x_action (HBM)
            pl.BlockSpec(memory_space=pl.ANY),                       # x_goal   (HBM)
            pl.BlockSpec((H_pad, H_pad), lambda i, la, lg: (0, 0)),  # w_a (resident)
            pl.BlockSpec((1, H_pad),     lambda i, la, lg: (0, 0)),  # b_a
            pl.BlockSpec((H_pad, H_pad), lambda i, la, lg: (0, 0)),  # w_g (resident)
            pl.BlockSpec((1, H_pad),     lambda i, la, lg: (0, 0)),  # b_g
        ],
        out_specs=pl.BlockSpec((TBR, BC), lambda i, la, lg: (i, 0)),
        scratch_shapes=[
            pltpu.VMEM((TBR, H_pad), jnp.float32),   # gathered action rows
            pltpu.VMEM((BC, H_pad), jnp.float32),    # gathered goal rows
            pltpu.VMEM((BC, H_pad), jnp.float32),    # projected goal embeddings
            pltpu.SemaphoreType.DMA((TBR,)),
            pltpu.SemaphoreType.DMA((B,)),
        ],
    )

    flops = 2 * (BR + BC) * H_pad * H_pad + 2 * BR * BC * H_pad
    bytes_accessed = ((BR + B) * H_pad * 4          # gathered f32 rows
                      + 2 * H_pad * H_pad * 2       # bf16 weights
                      + 2 * H_pad * 4               # biases
                      + BR * BC * 4)                # Q output
    cost = pl.CostEstimate(flops=flops,
                           transcendentals=(BR + BC) * H_pad,
                           bytes_accessed=bytes_accessed)

    q_pad = pl.pallas_call(
        functools.partial(_critic_kernel, n_goal_rows=B),
        out_shape=jax.ShapeDtypeStruct((BR, BC), jnp.float32),
        grid_spec=grid_spec,
        compiler_params=pltpu.CompilerParams(
            # goal embeddings are produced on step 0 and reused by later
            # steps, so the batch-tile axis must stay sequential.
            dimension_semantics=("arbitrary",),
            vmem_limit_bytes=32 * 1024 * 1024),
        cost_estimate=cost,
    )(len_a, len_g, xa, xg, wa, ba, wg, bg)

    return q_pad[:B, :B]


def _reference_forward(x_action, mask_action, x_goal, mask_goal,
                       w_a, b_a, w_g, b_g):
    """Plain-JAX reference mirroring the PyTorch semantics (and the kernel's
    bf16 MXU operands / f32 accumulation)."""
    B, S, H = x_action.shape
    la = _last_token_index(mask_action, S)
    lg = _last_token_index(mask_goal, S)
    rows_a = x_action[jnp.arange(B), la, :]
    rows_g = x_goal[jnp.arange(B), lg, :]
    bf = jnp.bfloat16
    emb_a = jnp.tanh(jnp.dot(rows_a.astype(bf), w_a.astype(bf),
                             preferred_element_type=jnp.float32)
                     + jnp.reshape(b_a, (1, H)))
    emb_g = jnp.tanh(jnp.dot(rows_g.astype(bf), w_g.astype(bf),
                             preferred_element_type=jnp.float32)
                     + jnp.reshape(b_g, (1, H)))
    return jnp.dot(emb_a.astype(bf), emb_g.astype(bf).T,
                   preferred_element_type=jnp.float32)


if __name__ == "__main__":
    B, S, H = 4, 8, 32
    key = jax.random.PRNGKey(0)
    k1, k2, k3, k4 = jax.random.split(key, 4)

    # synthetic token features standing in for embedded (s + ' ' + a) and g text
    x_action = jax.random.normal(k1, (B, S, H), dtype=jnp.float32)
    x_goal = jax.random.normal(k2, (B, S, H), dtype=jnp.float32)

    # padding masks with varying valid lengths (>= 1 each)
    lengths_a = jnp.array([8, 5, 3, 6], dtype=jnp.int32)
    lengths_g = jnp.array([4, 8, 2, 7], dtype=jnp.int32)
    pos = jnp.arange(S, dtype=jnp.int32)[None, :]
    mask_action = (pos < lengths_a[:, None]).astype(jnp.int32)
    mask_goal = (pos < lengths_g[:, None]).astype(jnp.int32)

    # deterministic synthetic encoder parameters (one linear layer per encoder)
    w_a = 0.1 * jax.random.normal(k3, (H, H), dtype=jnp.float32)
    w_g = 0.1 * jax.random.normal(k4, (H, H), dtype=jnp.float32)
    b_a = jnp.zeros((1, H), dtype=jnp.float32)
    b_g = jnp.zeros((1, H), dtype=jnp.float32)

    fwd = jax.jit(contrastive_critic_forward)
    q = jax.block_until_ready(fwd(x_action, mask_action, x_goal, mask_goal,
                                  w_a, b_a, w_g, b_g))

    q_ref = _reference_forward(x_action, mask_action, x_goal, mask_goal,
                               w_a, b_a, w_g, b_g)
    assert q.shape == (B, B)
    assert jnp.allclose(q, q_ref, atol=3e-2, rtol=3e-2), "mismatch vs reference"

    print("KERNEL_OK")
</pallas_src>

<mosaic_0001>
module attributes {stable_mosaic.version = 11 : i64} {
  func.func @_critic_kernel(%arg0: i32, %arg1: memref<8xi32, #tpu.memory_space<smem>>, %arg2: memref<4xi32, #tpu.memory_space<smem>>, %arg3: memref<8x8x128xf32, #tpu.memory_space<any>>, %arg4: memref<4x8x128xf32, #tpu.memory_space<any>>, %arg5: memref<128x128xbf16, #tpu.memory_space<vmem>>, %arg6: memref<1x128xf32, #tpu.memory_space<vmem>>, %arg7: memref<128x128xbf16, #tpu.memory_space<vmem>>, %arg8: memref<1x128xf32, #tpu.memory_space<vmem>>, %arg9: memref<8x128xf32, #tpu.memory_space<vmem>>, %arg10: memref<8x128xf32, #tpu.memory_space<vmem>>, %arg11: memref<128x128xf32, #tpu.memory_space<vmem>>, %arg12: memref<128x128xf32, #tpu.memory_space<vmem>>, %arg13: memref<8x!tpu.dma_semaphore, #tpu.memory_space<semaphore_mem>>, %arg14: memref<4x!tpu.dma_semaphore, #tpu.memory_space<semaphore_mem>>) attributes {dimension_semantics = [#tpu.dimension_semantics<arbitrary>], iteration_bounds = array<i64: 1>, scalar_prefetch = 2 : i64, scratch_operands = 5 : i64, tpu.core_type = #tpu.core_type<tc>, window_params = [{}, {}, {pipeline_mode = #tpu.pipeline_mode<synchronous>, transform_indices = @transform_2, window_bounds = array<i64: 128, 128>}, {pipeline_mode = #tpu.pipeline_mode<synchronous>, transform_indices = @transform_3, window_bounds = array<i64: 1, 128>}, {pipeline_mode = #tpu.pipeline_mode<synchronous>, transform_indices = @transform_4, window_bounds = array<i64: 128, 128>}, {pipeline_mode = #tpu.pipeline_mode<synchronous>, transform_indices = @transform_5, window_bounds = array<i64: 1, 128>}, {transform_indices = @transform_6, window_bounds = array<i64: 8, 128>}]} {
    %c0_i32 = arith.constant 0 : i32
    %0 = arith.cmpi eq, %arg0, %c0_i32 : i32
    %1 = arith.extui %0 : i1 to i32
    %c0_i32_0 = arith.constant 0 : i32
    %2 = arith.cmpi ne, %1, %c0_i32_0 : i32
    scf.if %2 {
      %cst_99 = arith.constant 0.000000e+00 : f32
      %144 = vector.broadcast %cst_99 : f32 to vector<128x128xf32>
      %c0_100 = arith.constant 0 : index
      %c0_101 = arith.constant 0 : index
      %145 = vector.load %arg11[%c0_100, %c0_101] : memref<128x128xf32, #tpu.memory_space<vmem>>, vector<128x128xf32>
      tpu.vector_store %arg11[%c0_100, %c0_101], %144 {strides = array<i32>} : memref<128x128xf32, #tpu.memory_space<vmem>>, vector<128x128xf32>,
      %c0_102 = arith.constant 0 : index
      %146 = memref.load %arg2[%c0_102] : memref<4xi32, #tpu.memory_space<smem>>
      %c1 = arith.constant 1 : index
      %147 = memref.load %arg2[%c1] : memref<4xi32, #tpu.memory_space<smem>>
      %c2 = arith.constant 2 : index
      %148 = memref.load %arg2[%c2] : memref<4xi32, #tpu.memory_space<smem>>
      %c3 = arith.constant 3 : index
      %149 = memref.load %arg2[%c3] : memref<4xi32, #tpu.memory_space<smem>>
      %c0_i32_103 = arith.constant 0 : i32
      %c0_i32_104 = arith.constant 0 : i32
      %c0_i32_105 = arith.constant 0 : i32
      %150 = tpu.memref_slice %arg4[%c0_i32_103, %146, %c0_i32_105] : memref<4x8x128xf32, #tpu.memory_space<any>> -> memref<1x1x128xf32, #tpu.memory_space<any>>
      %151 = tpu.memref_squeeze %150 : memref<1x1x128xf32, #tpu.memory_space<any>> -> memref<1x128xf32, #tpu.memory_space<any>>
      %c0_i32_106 = arith.constant 0 : i32
      %c0_i32_107 = arith.constant 0 : i32
      %152 = tpu.memref_slice %arg11[%c0_i32_106, %c0_i32_107] : memref<128x128xf32, #tpu.memory_space<vmem>> -> memref<1x128xf32, #tpu.memory_space<vmem>>
      %153 = tpu.memref_slice %arg14[%c0_i32_104] : memref<4x!tpu.dma_semaphore, #tpu.memory_space<semaphore_mem>> -> memref<1x!tpu.dma_semaphore, #tpu.memory_space<semaphore_mem>>
      %154 = tpu.memref_squeeze %153 : memref<1x!tpu.dma_semaphore, #tpu.memory_space<semaphore_mem>> -> memref<!tpu.dma_semaphore, #tpu.memory_space<semaphore_mem>>
      tpu.enqueue_dma source(%151 : memref<1x128xf32, #tpu.memory_space<any>>) target(%152 : memref<1x128xf32, #tpu.memory_space<vmem>>) target_semaphore(%154 : memref<!tpu.dma_semaphore, #tpu.memory_space<semaphore_mem>>)
      %c1_i32_108 = arith.constant 1 : i32
      %c1_i32_109 = arith.constant 1 : i32
      %c0_i32_110 = arith.constant 0 : i32
      %155 = tpu.memref_slice %arg4[%c1_i32_108, %147, %c0_i32_110] : memref<4x8x128xf32, #tpu.memory_space<any>> -> memref<1x1x128xf32, #tpu.memory_space<any>>
      %156 = tpu.memref_squeeze %155 : memref<1x1x128xf32, #tpu.memory_space<any>> -> memref<1x128xf32, #tpu.memory_space<any>>
      %c1_i32_111 = arith.constant 1 : i32
      %c0_i32_112 = arith.constant 0 : i32
      %157 = tpu.memref_slice %arg11[%c1_i32_111, %c0_i32_112] : memref<128x128xf32, #tpu.memory_space<vmem>> -> memref<1x128xf32, #tpu.memory_space<vmem>>
      %158 = tpu.memref_slice %arg14[%c1_i32_109] : memref<4x!tpu.dma_semaphore, #tpu.memory_space<semaphore_mem>> -> memref<1x!tpu.dma_semaphore, #tpu.memory_space<semaphore_mem>>
      %159 = tpu.memref_squeeze %158 : memref<1x!tpu.dma_semaphore, #tpu.memory_space<semaphore_mem>> -> memref<!tpu.dma_semaphore, #tpu.memory_space<semaphore_mem>>
      tpu.enqueue_dma source(%156 : memref<1x128xf32, #tpu.memory_space<any>>) target(%157 : memref<1x128xf32, #tpu.memory_space<vmem>>) target_semaphore(%159 : memref<!tpu.dma_semaphore, #tpu.memory_space<semaphore_mem>>)
      %c2_i32_113 = arith.constant 2 : i32
      %c2_i32_114 = arith.constant 2 : i32
      %c0_i32_115 = arith.constant 0 : i32
      %160 = tpu.memref_slice %arg4[%c2_i32_113, %148, %c0_i32_115] : memref<4x8x128xf32, #tpu.memory_space<any>> -> memref<1x1x128xf32, #tpu.memory_space<any>>
      %161 = tpu.memref_squeeze %160 : memref<1x1x128xf32, #tpu.memory_space<any>> -> memref<1x128xf32, #tpu.memory_space<any>>
      %c2_i32_116 = arith.constant 2 : i32
      %c0_i32_117 = arith.constant 0 : i32
      %162 = tpu.memref_slice %arg11[%c2_i32_116, %c0_i32_117] : memref<128x128xf32, #tpu.memory_space<vmem>> -> memref<1x128xf32, #tpu.memory_space<vmem>>
      %163 = tpu.memref_slice %arg14[%c2_i32_114] : memref<4x!tpu.dma_semaphore, #tpu.memory_space<semaphore_mem>> -> memref<1x!tpu.dma_semaphore, #tpu.memory_space<semaphore_mem>>
      %164 = tpu.memref_squeeze %163 : memref<1x!tpu.dma_semaphore, #tpu.memory_space<semaphore_mem>> -> memref<!tpu.dma_semaphore, #tpu.memory_space<semaphore_mem>>
      tpu.enqueue_dma source(%161 : memref<1x128xf32, #tpu.memory_space<any>>) target(%162 : memref<1x128xf32, #tpu.memory_space<vmem>>) target_semaphore(%164 : memref<!tpu.dma_semaphore, #tpu.memory_space<semaphore_mem>>)
      %c3_i32_118 = arith.constant 3 : i32
      %c3_i32_119 = arith.constant 3 : i32
      %c0_i32_120 = arith.constant 0 : i32
      %165 = tpu.memref_slice %arg4[%c3_i32_118, %149, %c0_i32_120] : memref<4x8x128xf32, #tpu.memory_space<any>> -> memref<1x1x128xf32, #tpu.memory_space<any>>
      %166 = tpu.memref_squeeze %165 : memref<1x1x128xf32, #tpu.memory_space<any>> -> memref<1x128xf32, #tpu.memory_space<any>>
      %c3_i32_121 = arith.constant 3 : i32
      %c0_i32_122 = arith.constant 0 : i32
      %167 = tpu.memref_slice %arg11[%c3_i32_121, %c0_i32_122] : memref<128x128xf32, #tpu.memory_space<vmem>> -> memref<1x128xf32, #tpu.memory_space<vmem>>
      %168 = tpu.memref_slice %arg14[%c3_i32_119] : memref<4x!tpu.dma_semaphore, #tpu.memory_space<semaphore_mem>> -> memref<1x!tpu.dma_semaphore, #tpu.memory_space<semaphore_mem>>
      %169 = tpu.memref_squeeze %168 : memref<1x!tpu.dma_semaphore, #tpu.memory_space<semaphore_mem>> -> memref<!tpu.dma_semaphore, #tpu.memory_space<semaphore_mem>>
      tpu.enqueue_dma source(%166 : memref<1x128xf32, #tpu.memory_space<any>>) target(%167 : memref<1x128xf32, #tpu.memory_space<vmem>>) target_semaphore(%169 : memref<!tpu.dma_semaphore, #tpu.memory_space<semaphore_mem>>)
      %c0_i32_123 = arith.constant 0 : i32
      %c0_i32_124 = arith.constant 0 : i32
      %c0_i32_125 = arith.constant 0 : i32
      %170 = tpu.memref_slice %arg4[%c0_i32_123, %146, %c0_i32_125] : memref<4x8x128xf32, #tpu.memory_space<any>> -> memref<1x1x128xf32, #tpu.memory_space<any>>
      %171 = tpu.memref_squeeze %170 : memref<1x1x128xf32, #tpu.memory_space<any>> -> memref<1x128xf32, #tpu.memory_space<any>>
      %c0_i32_126 = arith.constant 0 : i32
      %c0_i32_127 = arith.constant 0 : i32
      %172 = tpu.memref_slice %arg11[%c0_i32_126, %c0_i32_127] : memref<128x128xf32, #tpu.memory_space<vmem>> -> memref<1x128xf32, #tpu.memory_space<vmem>>
      %173 = tpu.memref_slice %arg14[%c0_i32_124] : memref<4x!tpu.dma_semaphore, #tpu.memory_space<semaphore_mem>> -> memref<1x!tpu.dma_semaphore, #tpu.memory_space<semaphore_mem>>
      %174 = tpu.memref_squeeze %173 : memref<1x!tpu.dma_semaphore, #tpu.memory_space<semaphore_mem>> -> memref<!tpu.dma_semaphore, #tpu.memory_space<semaphore_mem>>
      tpu.wait_dma2 semaphore(%174 : memref<!tpu.dma_semaphore, #tpu.memory_space<semaphore_mem>>) src(%171 : memref<1x128xf32, #tpu.memory_space<any>>) dst(%172 : memref<1x128xf32, #tpu.memory_space<vmem>>)
      %c1_i32_128 = arith.constant 1 : i32
      %c1_i32_129 = arith.constant 1 : i32
      %c0_i32_130 = arith.constant 0 : i32
      %175 = tpu.memref_slice %arg4[%c1_i32_128, %147, %c0_i32_130] : memref<4x8x128xf32, #tpu.memory_space<any>> -> memref<1x1x128xf32, #tpu.memory_space<any>>
      %176 = tpu.memref_squeeze %175 : memref<1x1x128xf32, #tpu.memory_space<any>> -> memref<1x128xf32, #tpu.memory_space<any>>
      %c1_i32_131 = arith.constant 1 : i32
      %c0_i32_132 = arith.constant 0 : i32
      %177 = tpu.memref_slice %arg11[%c1_i32_131, %c0_i32_132] : memref<128x128xf32, #tpu.memory_space<vmem>> -> memref<1x128xf32, #tpu.memory_space<vmem>>
      %178 = tpu.memref_slice %arg14[%c1_i32_129] : memref<4x!tpu.dma_semaphore, #tpu.memory_space<semaphore_mem>> -> memref<1x!tpu.dma_semaphore, #tpu.memory_space<semaphore_mem>>
      %179 = tpu.memref_squeeze %178 : memref<1x!tpu.dma_semaphore, #tpu.memory_space<semaphore_mem>> -> memref<!tpu.dma_semaphore, #tpu.memory_space<semaphore_mem>>
      tpu.wait_dma2 semaphore(%179 : memref<!tpu.dma_semaphore, #tpu.memory_space<semaphore_mem>>) src(%176 : memref<1x128xf32, #tpu.memory_space<any>>) dst(%177 : memref<1x128xf32, #tpu.memory_space<vmem>>)
      %c2_i32_133 = arith.constant 2 : i32
      %c2_i32_134 = arith.constant 2 : i32
      %c0_i32_135 = arith.constant 0 : i32
      %180 = tpu.memref_slice %arg4[%c2_i32_133, %148, %c0_i32_135] : memref<4x8x128xf32, #tpu.memory_space<any>> -> memref<1x1x128xf32, #tpu.memory_space<any>>
      %181 = tpu.memref_squeeze %180 : memref<1x1x128xf32, #tpu.memory_space<any>> -> memref<1x128xf32, #tpu.memory_space<any>>
      %c2_i32_136 = arith.constant 2 : i32
      %c0_i32_137 = arith.constant 0 : i32
      %182 = tpu.memref_slice %arg11[%c2_i32_136, %c0_i32_137] : memref<128x128xf32, #tpu.memory_space<vmem>> -> memref<1x128xf32, #tpu.memory_space<vmem>>
      %183 = tpu.memref_slice %arg14[%c2_i32_134] : memref<4x!tpu.dma_semaphore, #tpu.memory_space<semaphore_mem>> -> memref<1x!tpu.dma_semaphore, #tpu.memory_space<semaphore_mem>>
      %184 = tpu.memref_squeeze %183 : memref<1x!tpu.dma_semaphore, #tpu.memory_space<semaphore_mem>> -> memref<!tpu.dma_semaphore, #tpu.memory_space<semaphore_mem>>
      tpu.wait_dma2 semaphore(%184 : memref<!tpu.dma_semaphore, #tpu.memory_space<semaphore_mem>>) src(%181 : memref<1x128xf32, #tpu.memory_space<any>>) dst(%182 : memref<1x128xf32, #tpu.memory_space<vmem>>)
      %c3_i32_138 = arith.constant 3 : i32
      %c3_i32_139 = arith.constant 3 : i32
      %c0_i32_140 = arith.constant 0 : i32
      %185 = tpu.memref_slice %arg4[%c3_i32_138, %149, %c0_i32_140] : memref<4x8x128xf32, #tpu.memory_space<any>> -> memref<1x1x128xf32, #tpu.memory_space<any>>
      %186 = tpu.memref_squeeze %185 : memref<1x1x128xf32, #tpu.memory_space<any>> -> memref<1x128xf32, #tpu.memory_space<any>>
      %c3_i32_141 = arith.constant 3 : i32
      %c0_i32_142 = arith.constant 0 : i32
      %187 = tpu.memref_slice %arg11[%c3_i32_141, %c0_i32_142] : memref<128x128xf32, #tpu.memory_space<vmem>> -> memref<1x128xf32, #tpu.memory_space<vmem>>
      %188 = tpu.memref_slice %arg14[%c3_i32_139] : memref<4x!tpu.dma_semaphore, #tpu.memory_space<semaphore_mem>> -> memref<1x!tpu.dma_semaphore, #tpu.memory_space<semaphore_mem>>
      %189 = tpu.memref_squeeze %188 : memref<1x!tpu.dma_semaphore, #tpu.memory_space<semaphore_mem>> -> memref<!tpu.dma_semaphore, #tpu.memory_space<semaphore_mem>>
      tpu.wait_dma2 semaphore(%189 : memref<!tpu.dma_semaphore, #tpu.memory_space<semaphore_mem>>) src(%186 : memref<1x128xf32, #tpu.memory_space<any>>) dst(%187 : memref<1x128xf32, #tpu.memory_space<vmem>>)
      %c0_143 = arith.constant 0 : index
      %c0_144 = arith.constant 0 : index
      %190 = vector.load %arg11[%c0_143, %c0_144] : memref<128x128xf32, #tpu.memory_space<vmem>>, vector<128x128xf32>
      %191 = arith.truncf %190 : vector<128x128xf32> to vector<128x128xbf16>
      %c0_145 = arith.constant 0 : index
      %c0_146 = arith.constant 0 : index
      %192 = vector.load %arg7[%c0_145, %c0_146] : memref<128x128xbf16, #tpu.memory_space<vmem>>, vector<128x128xbf16>
      %cst_147 = arith.constant dense<0.000000e+00> : vector<128x128xf32>
      %193 = tpu.matmul %191, %192, %cst_147 {dimension_numbers = #tpu.dot_dimension_numbers<[1], [0], [0], [1], [0, 0, 1, 1], [], []>} : vector<128x128xbf16>, vector<128x128xbf16>, vector<128x128xf32> -> vector<128x128xf32>
      %c0_148 = arith.constant 0 : index
      %c0_149 = arith.constant 0 : index
      %194 = vector.load %arg8[%c0_148, %c0_149] : memref<1x128xf32, #tpu.memory_space<vmem>>, vector<1x128xf32>
      %195 = vector.broadcast %194 : vector<1x128xf32> to vector<128x128xf32>
      %196 = arith.addf %193, %195 : vector<128x128xf32>
      %197 = math.tanh %196 : vector<128x128xf32>
      %c0_150 = arith.constant 0 : index
      %c0_151 = arith.constant 0 : index
      %198 = vector.load %arg12[%c0_150, %c0_151] : memref<128x128xf32, #tpu.memory_space<vmem>>, vector<128x128xf32>
      tpu.vector_store %arg12[%c0_150, %c0_151], %197 {strides = array<i32>} : memref<128x128xf32, #tpu.memory_space<vmem>>, vector<128x128xf32>,
    } else {
    }
    %c8_i32 = arith.constant 8 : i32
    %3 = arith.muli %arg0, %c8_i32 : i32
    %c0_i32_1 = arith.constant 0 : i32
    %4 = arith.addi %3, %c0_i32_1 : i32
    %c8_i32_2 = arith.constant 8 : i32
    %5 = arith.muli %arg0, %c8_i32_2 : i32
    %c0_i32_3 = arith.constant 0 : i32
    %6 = arith.addi %5, %c0_i32_3 : i32
    %7 = arith.index_cast %6 : i32 to index
    %8 = memref.load %arg1[%7] : memref<8xi32, #tpu.memory_space<smem>>
    %c8_i32_4 = arith.constant 8 : i32
    %9 = arith.muli %arg0, %c8_i32_4 : i32
    %c1_i32 = arith.constant 1 : i32
    %10 = arith.addi %9, %c1_i32 : i32
    %c8_i32_5 = arith.constant 8 : i32
    %11 = arith.muli %arg0, %c8_i32_5 : i32
    %c1_i32_6 = arith.constant 1 : i32
    %12 = arith.addi %11, %c1_i32_6 : i32
    %13 = arith.index_cast %12 : i32 to index
    %14 = memref.load %arg1[%13] : memref<8xi32, #tpu.memory_space<smem>>
    %c8_i32_7 = arith.constant 8 : i32
    %15 = arith.muli %arg0, %c8_i32_7 : i32
    %c2_i32 = arith.constant 2 : i32
    %16 = arith.addi %15, %c2_i32 : i32
    %c8_i32_8 = arith.constant 8 : i32
    %17 = arith.muli %arg0, %c8_i32_8 : i32
    %c2_i32_9 = arith.constant 2 : i32
    %18 = arith.addi %17, %c2_i32_9 : i32
    %19 = arith.index_cast %18 : i32 to index
    %20 = memref.load %arg1[%19] : memref<8xi32, #tpu.memory_space<smem>>
    %c8_i32_10 = arith.constant 8 : i32
    %21 = arith.muli %arg0, %c8_i32_10 : i32
    %c3_i32 = arith.constant 3 : i32
    %22 = arith.addi %21, %c3_i32 : i32
    %c8_i32_11 = arith.constant 8 : i32
    %23 = arith.muli %arg0, %c8_i32_11 : i32
    %c3_i32_12 = arith.constant 3 : i32
    %24 = arith.addi %23, %c3_i32_12 : i32
    %25 = arith.index_cast %24 : i32 to index
    %26 = memref.load %arg1[%25] : memref<8xi32, #tpu.memory_space<smem>>
    %c8_i32_13 = arith.constant 8 : i32
    %27 = arith.muli %arg0, %c8_i32_13 : i32
    %c4_i32 = arith.constant 4 : i32
    %28 = arith.addi %27, %c4_i32 : i32
    %c8_i32_14 = arith.constant 8 : i32
    %29 = arith.muli %arg0, %c8_i32_14 : i32
    %c4_i32_15 = arith.constant 4 : i32
    %30 = arith.addi %29, %c4_i32_15 : i32
    %31 = arith.index_cast %30 : i32 to index
    %32 = memref.load %arg1[%31] : memref<8xi32, #tpu.memory_space<smem>>
    %c8_i32_16 = arith.constant 8 : i32
    %33 = arith.muli %arg0, %c8_i32_16 : i32
    %c5_i32 = arith.constant 5 : i32
    %34 = arith.addi %33, %c5_i32 : i32
    %c8_i32_17 = arith.constant 8 : i32
    %35 = arith.muli %arg0, %c8_i32_17 : i32
    %c5_i32_18 = arith.constant 5 : i32
    %36 = arith.addi %35, %c5_i32_18 : i32
    %37 = arith.index_cast %36 : i32 to index
    %38 = memref.load %arg1[%37] : memref<8xi32, #tpu.memory_space<smem>>
    %c8_i32_19 = arith.constant 8 : i32
    %39 = arith.muli %arg0, %c8_i32_19 : i32
    %c6_i32 = arith.constant 6 : i32
    %40 = arith.addi %39, %c6_i32 : i32
    %c8_i32_20 = arith.constant 8 : i32
    %41 = arith.muli %arg0, %c8_i32_20 : i32
    %c6_i32_21 = arith.constant 6 : i32
    %42 = arith.addi %41, %c6_i32_21 : i32
    %43 = arith.index_cast %42 : i32 to index
    %44 = memref.load %arg1[%43] : memref<8xi32, #tpu.memory_space<smem>>
    %c8_i32_22 = arith.constant 8 : i32
    %45 = arith.muli %arg0, %c8_i32_22 : i32
    %c7_i32 = arith.constant 7 : i32
    %46 = arith.addi %45, %c7_i32 : i32
    %c8_i32_23 = arith.constant 8 : i32
    %47 = arith.muli %arg0, %c8_i32_23 : i32
    %c7_i32_24 = arith.constant 7 : i32
    %48 = arith.addi %47, %c7_i32_24 : i32
    %49 = arith.index_cast %48 : i32 to index
    %50 = memref.load %arg1[%49] : memref<8xi32, #tpu.memory_space<smem>>
    %c0_i32_25 = arith.constant 0 : i32
    %c0_i32_26 = arith.constant 0 : i32
    %51 = tpu.memref_slice %arg3[%4, %8, %c0_i32_26] : memref<8x8x128xf32, #tpu.memory_space<any>> -> memref<1x1x128xf32, #tpu.memory_space<any>>
    %52 = tpu.memref_squeeze %51 : memref<1x1x128xf32, #tpu.memory_space<any>> -> memref<1x128xf32, #tpu.memory_space<any>>
    %c0_i32_27 = arith.constant 0 : i32
    %c0_i32_28 = arith.constant 0 : i32
    %53 = tpu.memref_slice %arg10[%c0_i32_27, %c0_i32_28] : memref<8x128xf32, #tpu.memory_space<vmem>> -> memref<1x128xf32, #tpu.memory_space<vmem>>
    %54 = tpu.memref_slice %arg13[%c0_i32_25] : memref<8x!tpu.dma_semaphore, #tpu.memory_space<semaphore_mem>> -> memref<1x!tpu.dma_semaphore, #tpu.memory_space<semaphore_mem>>
    %55 = tpu.memref_squeeze %54 : memref<1x!tpu.dma_semaphore, #tpu.memory_space<semaphore_mem>> -> memref<!tpu.dma_semaphore, #tpu.memory_space<semaphore_mem>>
    tpu.enqueue_dma source(%52 : memref<1x128xf32, #tpu.memory_space<any>>) target(%53 : memref<1x128xf32, #tpu.memory_space<vmem>>) target_semaphore(%55 : memref<!tpu.dma_semaphore, #tpu.memory_space<semaphore_mem>>)
    %c1_i32_29 = arith.constant 1 : i32
    %c0_i32_30 = arith.constant 0 : i32
    %56 = tpu.memref_slice %arg3[%10, %14, %c0_i32_30] : memref<8x8x128xf32, #tpu.memory_space<any>> -> memref<1x1x128xf32, #tpu.memory_space<any>>
    %57 = tpu.memref_squeeze %56 : memref<1x1x128xf32, #tpu.memory_space<any>> -> memref<1x128xf32, #tpu.memory_space<any>>
    %c1_i32_31 = arith.constant 1 : i32
    %c0_i32_32 = arith.constant 0 : i32
    %58 = tpu.memref_slice %arg10[%c1_i32_31, %c0_i32_32] : memref<8x128xf32, #tpu.memory_space<vmem>> -> memref<1x128xf32, #tpu.memory_space<vmem>>
    %59 = tpu.memref_slice %arg13[%c1_i32_29] : memref<8x!tpu.dma_semaphore, #tpu.memory_space<semaphore_mem>> -> memref<1x!tpu.dma_semaphore, #tpu.memory_space<semaphore_mem>>
    %60 = tpu.memref_squeeze %59 : memref<1x!tpu.dma_semaphore, #tpu.memory_space<semaphore_mem>> -> memref<!tpu.dma_semaphore, #tpu.memory_space<semaphore_mem>>
    tpu.enqueue_dma source(%57 : memref<1x128xf32, #tpu.memory_space<any>>) target(%58 : memref<1x128xf32, #tpu.memory_space<vmem>>) target_semaphore(%60 : memref<!tpu.dma_semaphore, #tpu.memory_space<semaphore_mem>>)
    %c2_i32_33 = arith.constant 2 : i32
    %c0_i32_34 = arith.constant 0 : i32
    %61 = tpu.memref_slice %arg3[%16, %20, %c0_i32_34] : memref<8x8x128xf32, #tpu.memory_space<any>> -> memref<1x1x128xf32, #tpu.memory_space<any>>
    %62 = tpu.memref_squeeze %61 : memref<1x1x128xf32, #tpu.memory_space<any>> -> memref<1x128xf32, #tpu.memory_space<any>>
    %c2_i32_35 = arith.constant 2 : i32
    %c0_i32_36 = arith.constant 0 : i32
    %63 = tpu.memref_slice %arg10[%c2_i32_35, %c0_i32_36] : memref<8x128xf32, #tpu.memory_space<vmem>> -> memref<1x128xf32, #tpu.memory_space<vmem>>
    %64 = tpu.memref_slice %arg13[%c2_i32_33] : memref<8x!tpu.dma_semaphore, #tpu.memory_space<semaphore_mem>> -> memref<1x!tpu.dma_semaphore, #tpu.memory_space<semaphore_mem>>
    %65 = tpu.memref_squeeze %64 : memref<1x!tpu.dma_semaphore, #tpu.memory_space<semaphore_mem>> -> memref<!tpu.dma_semaphore, #tpu.memory_space<semaphore_mem>>
    tpu.enqueue_dma source(%62 : memref<1x128xf32, #tpu.memory_space<any>>) target(%63 : memref<1x128xf32, #tpu.memory_space<vmem>>) target_semaphore(%65 : memref<!tpu.dma_semaphore, #tpu.memory_space<semaphore_mem>>)
    %c3_i32_37 = arith.constant 3 : i32
    %c0_i32_38 = arith.constant 0 : i32
    %66 = tpu.memref_slice %arg3[%22, %26, %c0_i32_38] : memref<8x8x128xf32, #tpu.memory_space<any>> -> memref<1x1x128xf32, #tpu.memory_space<any>>
    %67 = tpu.memref_squeeze %66 : memref<1x1x128xf32, #tpu.memory_space<any>> -> memref<1x128xf32, #tpu.memory_space<any>>
    %c3_i32_39 = arith.constant 3 : i32
    %c0_i32_40 = arith.constant 0 : i32
    %68 = tpu.memref_slice %arg10[%c3_i32_39, %c0_i32_40] : memref<8x128xf32, #tpu.memory_space<vmem>> -> memref<1x128xf32, #tpu.memory_space<vmem>>
    %69 = tpu.memref_slice %arg13[%c3_i32_37] : memref<8x!tpu.dma_semaphore, #tpu.memory_space<semaphore_mem>> -> memref<1x!tpu.dma_semaphore, #tpu.memory_space<semaphore_mem>>
    %70 = tpu.memref_squeeze %69 : memref<1x!tpu.dma_semaphore, #tpu.memory_space<semaphore_mem>> -> memref<!tpu.dma_semaphore, #tpu.memory_space<semaphore_mem>>
    tpu.enqueue_dma source(%67 : memref<1x128xf32, #tpu.memory_space<any>>) target(%68 : memref<1x128xf32, #tpu.memory_space<vmem>>) target_semaphore(%70 : memref<!tpu.dma_semaphore, #tpu.memory_space<semaphore_mem>>)
    %c4_i32_41 = arith.constant 4 : i32
    %c0_i32_42 = arith.constant 0 : i32
    %71 = tpu.memref_slice %arg3[%28, %32, %c0_i32_42] : memref<8x8x128xf32, #tpu.memory_space<any>> -> memref<1x1x128xf32, #tpu.memory_space<any>>
    %72 = tpu.memref_squeeze %71 : memref<1x1x128xf32, #tpu.memory_space<any>> -> memref<1x128xf32, #tpu.memory_space<any>>
    %c4_i32_43 = arith.constant 4 : i32
    %c0_i32_44 = arith.constant 0 : i32
    %73 = tpu.memref_slice %arg10[%c4_i32_43, %c0_i32_44] : memref<8x128xf32, #tpu.memory_space<vmem>> -> memref<1x128xf32, #tpu.memory_space<vmem>>
    %74 = tpu.memref_slice %arg13[%c4_i32_41] : memref<8x!tpu.dma_semaphore, #tpu.memory_space<semaphore_mem>> -> memref<1x!tpu.dma_semaphore, #tpu.memory_space<semaphore_mem>>
    %75 = tpu.memref_squeeze %74 : memref<1x!tpu.dma_semaphore, #tpu.memory_space<semaphore_mem>> -> memref<!tpu.dma_semaphore, #tpu.memory_space<semaphore_mem>>
    tpu.enqueue_dma source(%72 : memref<1x128xf32, #tpu.memory_space<any>>) target(%73 : memref<1x128xf32, #tpu.memory_space<vmem>>) target_semaphore(%75 : memref<!tpu.dma_semaphore, #tpu.memory_space<semaphore_mem>>)
    %c5_i32_45 = arith.constant 5 : i32
    %c0_i32_46 = arith.constant 0 : i32
    %76 = tpu.memref_slice %arg3[%34, %38, %c0_i32_46] : memref<8x8x128xf32, #tpu.memory_space<any>> -> memref<1x1x128xf32, #tpu.memory_space<any>>
    %77 = tpu.memref_squeeze %76 : memref<1x1x128xf32, #tpu.memory_space<any>> -> memref<1x128xf32, #tpu.memory_space<any>>
    %c5_i32_47 = arith.constant 5 : i32
    %c0_i32_48 = arith.constant 0 : i32
    %78 = tpu.memref_slice %arg10[%c5_i32_47, %c0_i32_48] : memref<8x128xf32, #tpu.memory_space<vmem>> -> memref<1x128xf32, #tpu.memory_space<vmem>>
    %79 = tpu.memref_slice %arg13[%c5_i32_45] : memref<8x!tpu.dma_semaphore, #tpu.memory_space<semaphore_mem>> -> memref<1x!tpu.dma_semaphore, #tpu.memory_space<semaphore_mem>>
    %80 = tpu.memref_squeeze %79 : memref<1x!tpu.dma_semaphore, #tpu.memory_space<semaphore_mem>> -> memref<!tpu.dma_semaphore, #tpu.memory_space<semaphore_mem>>
    tpu.enqueue_dma source(%77 : memref<1x128xf32, #tpu.memory_space<any>>) target(%78 : memref<1x128xf32, #tpu.memory_space<vmem>>) target_semaphore(%80 : memref<!tpu.dma_semaphore, #tpu.memory_space<semaphore_mem>>)
    %c6_i32_49 = arith.constant 6 : i32
    %c0_i32_50 = arith.constant 0 : i32
    %81 = tpu.memref_slice %arg3[%40, %44, %c0_i32_50] : memref<8x8x128xf32, #tpu.memory_space<any>> -> memref<1x1x128xf32, #tpu.memory_space<any>>
    %82 = tpu.memref_squeeze %81 : memref<1x1x128xf32, #tpu.memory_space<any>> -> memref<1x128xf32, #tpu.memory_space<any>>
    %c6_i32_51 = arith.constant 6 : i32
    %c0_i32_52 = arith.constant 0 : i32
    %83 = tpu.memref_slice %arg10[%c6_i32_51, %c0_i32_52] : memref<8x128xf32, #tpu.memory_space<vmem>> -> memref<1x128xf32, #tpu.memory_space<vmem>>
    %84 = tpu.memref_slice %arg13[%c6_i32_49] : memref<8x!tpu.dma_semaphore, #tpu.memory_space<semaphore_mem>> -> memref<1x!tpu.dma_semaphore, #tpu.memory_space<semaphore_mem>>
    %85 = tpu.memref_squeeze %84 : memref<1x!tpu.dma_semaphore, #tpu.memory_space<semaphore_mem>> -> memref<!tpu.dma_semaphore, #tpu.memory_space<semaphore_mem>>
    tpu.enqueue_dma source(%82 : memref<1x128xf32, #tpu.memory_space<any>>) target(%83 : memref<1x128xf32, #tpu.memory_space<vmem>>) target_semaphore(%85 : memref<!tpu.dma_semaphore, #tpu.memory_space<semaphore_mem>>)
    %c7_i32_53 = arith.constant 7 : i32
    %c0_i32_54 = arith.constant 0 : i32
    %86 = tpu.memref_slice %arg3[%46, %50, %c0_i32_54] : memref<8x8x128xf32, #tpu.memory_space<any>> -> memref<1x1x128xf32, #tpu.memory_space<any>>
    %87 = tpu.memref_squeeze %86 : memref<1x1x128xf32, #tpu.memory_space<any>> -> memref<1x128xf32, #tpu.memory_space<any>>
    %c7_i32_55 = arith.constant 7 : i32
    %c0_i32_56 = arith.constant 0 : i32
    %88 = tpu.memref_slice %arg10[%c7_i32_55, %c0_i32_56] : memref<8x128xf32, #tpu.memory_space<vmem>> -> memref<1x128xf32, #tpu.memory_space<vmem>>
    %89 = tpu.memref_slice %arg13[%c7_i32_53] : memref<8x!tpu.dma_semaphore, #tpu.memory_space<semaphore_mem>> -> memref<1x!tpu.dma_semaphore, #tpu.memory_space<semaphore_mem>>
    %90 = tpu.memref_squeeze %89 : memref<1x!tpu.dma_semaphore, #tpu.memory_space<semaphore_mem>> -> memref<!tpu.dma_semaphore, #tpu.memory_space<semaphore_mem>>
    tpu.enqueue_dma source(%87 : memref<1x128xf32, #tpu.memory_space<any>>) target(%88 : memref<1x128xf32, #tpu.memory_space<vmem>>) target_semaphore(%90 : memref<!tpu.dma_semaphore, #tpu.memory_space<semaphore_mem>>)
    %c0_i32_57 = arith.constant 0 : i32
    %c0_i32_58 = arith.constant 0 : i32
    %91 = tpu.memref_slice %arg3[%4, %8, %c0_i32_58] : memref<8x8x128xf32, #tpu.memory_space<any>> -> memref<1x1x128xf32, #tpu.memory_space<any>>
    %92 = tpu.memref_squeeze %91 : memref<1x1x128xf32, #tpu.memory_space<any>> -> memref<1x128xf32, #tpu.memory_space<any>>
    %c0_i32_59 = arith.constant 0 : i32
    %c0_i32_60 = arith.constant 0 : i32
    %93 = tpu.memref_slice %arg10[%c0_i32_59, %c0_i32_60] : memref<8x128xf32, #tpu.memory_space<vmem>> -> memref<1x128xf32, #tpu.memory_space<vmem>>
    %94 = tpu.memref_slice %arg13[%c0_i32_57] : memref<8x!tpu.dma_semaphore, #tpu.memory_space<semaphore_mem>> -> memref<1x!tpu.dma_semaphore, #tpu.memory_space<semaphore_mem>>
    %95 = tpu.memref_squeeze %94 : memref<1x!tpu.dma_semaphore, #tpu.memory_space<semaphore_mem>> -> memref<!tpu.dma_semaphore, #tpu.memory_space<semaphore_mem>>
    tpu.wait_dma2 semaphore(%95 : memref<!tpu.dma_semaphore, #tpu.memory_space<semaphore_mem>>) src(%92 : memref<1x128xf32, #tpu.memory_space<any>>) dst(%93 : memref<1x128xf32, #tpu.memory_space<vmem>>)
    %c1_i32_61 = arith.constant 1 : i32
    %c0_i32_62 = arith.constant 0 : i32
    %96 = tpu.memref_slice %arg3[%10, %14, %c0_i32_62] : memref<8x8x128xf32, #tpu.memory_space<any>> -> memref<1x1x128xf32, #tpu.memory_space<any>>
    %97 = tpu.memref_squeeze %96 : memref<1x1x128xf32, #tpu.memory_space<any>> -> memref<1x128xf32, #tpu.memory_space<any>>
    %c1_i32_63 = arith.constant 1 : i32
    %c0_i32_64 = arith.constant 0 : i32
    %98 = tpu.memref_slice %arg10[%c1_i32_63, %c0_i32_64] : memref<8x128xf32, #tpu.memory_space<vmem>> -> memref<1x128xf32, #tpu.memory_space<vmem>>
    %99 = tpu.memref_slice %arg13[%c1_i32_61] : memref<8x!tpu.dma_semaphore, #tpu.memory_space<semaphore_mem>> -> memref<1x!tpu.dma_semaphore, #tpu.memory_space<semaphore_mem>>
    %100 = tpu.memref_squeeze %99 : memref<1x!tpu.dma_semaphore, #tpu.memory_space<semaphore_mem>> -> memref<!tpu.dma_semaphore, #tpu.memory_space<semaphore_mem>>
    tpu.wait_dma2 semaphore(%100 : memref<!tpu.dma_semaphore, #tpu.memory_space<semaphore_mem>>) src(%97 : memref<1x128xf32, #tpu.memory_space<any>>) dst(%98 : memref<1x128xf32, #tpu.memory_space<vmem>>)
    %c2_i32_65 = arith.constant 2 : i32
    %c0_i32_66 = arith.constant 0 : i32
    %101 = tpu.memref_slice %arg3[%16, %20, %c0_i32_66] : memref<8x8x128xf32, #tpu.memory_space<any>> -> memref<1x1x128xf32, #tpu.memory_space<any>>
    %102 = tpu.memref_squeeze %101 : memref<1x1x128xf32, #tpu.memory_space<any>> -> memref<1x128xf32, #tpu.memory_space<any>>
    %c2_i32_67 = arith.constant 2 : i32
    %c0_i32_68 = arith.constant 0 : i32
    %103 = tpu.memref_slice %arg10[%c2_i32_67, %c0_i32_68] : memref<8x128xf32, #tpu.memory_space<vmem>> -> memref<1x128xf32, #tpu.memory_space<vmem>>
    %104 = tpu.memref_slice %arg13[%c2_i32_65] : memref<8x!tpu.dma_semaphore, #tpu.memory_space<semaphore_mem>> -> memref<1x!tpu.dma_semaphore, #tpu.memory_space<semaphore_mem>>
    %105 = tpu.memref_squeeze %104 : memref<1x!tpu.dma_semaphore, #tpu.memory_space<semaphore_mem>> -> memref<!tpu.dma_semaphore, #tpu.memory_space<semaphore_mem>>
    tpu.wait_dma2 semaphore(%105 : memref<!tpu.dma_semaphore, #tpu.memory_space<semaphore_mem>>) src(%102 : memref<1x128xf32, #tpu.memory_space<any>>) dst(%103 : memref<1x128xf32, #tpu.memory_space<vmem>>)
    %c3_i32_69 = arith.constant 3 : i32
    %c0_i32_70 = arith.constant 0 : i32
    %106 = tpu.memref_slice %arg3[%22, %26, %c0_i32_70] : memref<8x8x128xf32, #tpu.memory_space<any>> -> memref<1x1x128xf32, #tpu.memory_space<any>>
    %107 = tpu.memref_squeeze %106 : memref<1x1x128xf32, #tpu.memory_space<any>> -> memref<1x128xf32, #tpu.memory_space<any>>
    %c3_i32_71 = arith.constant 3 : i32
    %c0_i32_72 = arith.constant 0 : i32
    %108 = tpu.memref_slice %arg10[%c3_i32_71, %c0_i32_72] : memref<8x128xf32, #tpu.memory_space<vmem>> -> memref<1x128xf32, #tpu.memory_space<vmem>>
    %109 = tpu.memref_slice %arg13[%c3_i32_69] : memref<8x!tpu.dma_semaphore, #tpu.memory_space<semaphore_mem>> -> memref<1x!tpu.dma_semaphore, #tpu.memory_space<semaphore_mem>>
    %110 = tpu.memref_squeeze %109 : memref<1x!tpu.dma_semaphore, #tpu.memory_space<semaphore_mem>> -> memref<!tpu.dma_semaphore, #tpu.memory_space<semaphore_mem>>
    tpu.wait_dma2 semaphore(%110 : memref<!tpu.dma_semaphore, #tpu.memory_space<semaphore_mem>>) src(%107 : memref<1x128xf32, #tpu.memory_space<any>>) dst(%108 : memref<1x128xf32, #tpu.memory_space<vmem>>)
    %c4_i32_73 = arith.constant 4 : i32
    %c0_i32_74 = arith.constant 0 : i32
    %111 = tpu.memref_slice %arg3[%28, %32, %c0_i32_74] : memref<8x8x128xf32, #tpu.memory_space<any>> -> memref<1x1x128xf32, #tpu.memory_space<any>>
    %112 = tpu.memref_squeeze %111 : memref<1x1x128xf32, #tpu.memory_space<any>> -> memref<1x128xf32, #tpu.memory_space<any>>
    %c4_i32_75 = arith.constant 4 : i32
    %c0_i32_76 = arith.constant 0 : i32
    %113 = tpu.memref_slice %arg10[%c4_i32_75, %c0_i32_76] : memref<8x128xf32, #tpu.memory_space<vmem>> -> memref<1x128xf32, #tpu.memory_space<vmem>>
    %114 = tpu.memref_slice %arg13[%c4_i32_73] : memref<8x!tpu.dma_semaphore, #tpu.memory_space<semaphore_mem>> -> memref<1x!tpu.dma_semaphore, #tpu.memory_space<semaphore_mem>>
    %115 = tpu.memref_squeeze %114 : memref<1x!tpu.dma_semaphore, #tpu.memory_space<semaphore_mem>> -> memref<!tpu.dma_semaphore, #tpu.memory_space<semaphore_mem>>
    tpu.wait_dma2 semaphore(%115 : memref<!tpu.dma_semaphore, #tpu.memory_space<semaphore_mem>>) src(%112 : memref<1x128xf32, #tpu.memory_space<any>>) dst(%113 : memref<1x128xf32, #tpu.memory_space<vmem>>)
    %c5_i32_77 = arith.constant 5 : i32
    %c0_i32_78 = arith.constant 0 : i32
    %116 = tpu.memref_slice %arg3[%34, %38, %c0_i32_78] : memref<8x8x128xf32, #tpu.memory_space<any>> -> memref<1x1x128xf32, #tpu.memory_space<any>>
    %117 = tpu.memref_squeeze %116 : memref<1x1x128xf32, #tpu.memory_space<any>> -> memref<1x128xf32, #tpu.memory_space<any>>
    %c5_i32_79 = arith.constant 5 : i32
    %c0_i32_80 = arith.constant 0 : i32
    %118 = tpu.memref_slice %arg10[%c5_i32_79, %c0_i32_80] : memref<8x128xf32, #tpu.memory_space<vmem>> -> memref<1x128xf32, #tpu.memory_space<vmem>>
    %119 = tpu.memref_slice %arg13[%c5_i32_77] : memref<8x!tpu.dma_semaphore, #tpu.memory_space<semaphore_mem>> -> memref<1x!tpu.dma_semaphore, #tpu.memory_space<semaphore_mem>>
    %120 = tpu.memref_squeeze %119 : memref<1x!tpu.dma_semaphore, #tpu.memory_space<semaphore_mem>> -> memref<!tpu.dma_semaphore, #tpu.memory_space<semaphore_mem>>
    tpu.wait_dma2 semaphore(%120 : memref<!tpu.dma_semaphore, #tpu.memory_space<semaphore_mem>>) src(%117 : memref<1x128xf32, #tpu.memory_space<any>>) dst(%118 : memref<1x128xf32, #tpu.memory_space<vmem>>)
    %c6_i32_81 = arith.constant 6 : i32
    %c0_i32_82 = arith.constant 0 : i32
    %121 = tpu.memref_slice %arg3[%40, %44, %c0_i32_82] : memref<8x8x128xf32, #tpu.memory_space<any>> -> memref<1x1x128xf32, #tpu.memory_space<any>>
    %122 = tpu.memref_squeeze %121 : memref<1x1x128xf32, #tpu.memory_space<any>> -> memref<1x128xf32, #tpu.memory_space<any>>
    %c6_i32_83 = arith.constant 6 : i32
    %c0_i32_84 = arith.constant 0 : i32
    %123 = tpu.memref_slice %arg10[%c6_i32_83, %c0_i32_84] : memref<8x128xf32, #tpu.memory_space<vmem>> -> memref<1x128xf32, #tpu.memory_space<vmem>>
    %124 = tpu.memref_slice %arg13[%c6_i32_81] : memref<8x!tpu.dma_semaphore, #tpu.memory_space<semaphore_mem>> -> memref<1x!tpu.dma_semaphore, #tpu.memory_space<semaphore_mem>>
    %125 = tpu.memref_squeeze %124 : memref<1x!tpu.dma_semaphore, #tpu.memory_space<semaphore_mem>> -> memref<!tpu.dma_semaphore, #tpu.memory_space<semaphore_mem>>
    tpu.wait_dma2 semaphore(%125 : memref<!tpu.dma_semaphore, #tpu.memory_space<semaphore_mem>>) src(%122 : memref<1x128xf32, #tpu.memory_space<any>>) dst(%123 : memref<1x128xf32, #tpu.memory_space<vmem>>)
    %c7_i32_85 = arith.constant 7 : i32
    %c0_i32_86 = arith.constant 0 : i32
    %126 = tpu.memref_slice %arg3[%46, %50, %c0_i32_86] : memref<8x8x128xf32, #tpu.memory_space<any>> -> memref<1x1x128xf32, #tpu.memory_space<any>>
    %127 = tpu.memref_squeeze %126 : memref<1x1x128xf32, #tpu.memory_space<any>> -> memref<1x128xf32, #tpu.memory_space<any>>
    %c7_i32_87 = arith.constant 7 : i32
    %c0_i32_88 = arith.constant 0 : i32
    %128 = tpu.memref_slice %arg10[%c7_i32_87, %c0_i32_88] : memref<8x128xf32, #tpu.memory_space<vmem>> -> memref<1x128xf32, #tpu.memory_space<vmem>>
    %129 = tpu.memref_slice %arg13[%c7_i32_85] : memref<8x!tpu.dma_semaphore, #tpu.memory_space<semaphore_mem>> -> memref<1x!tpu.dma_semaphore, #tpu.memory_space<semaphore_mem>>
    %130 = tpu.memref_squeeze %129 : memref<1x!tpu.dma_semaphore, #tpu.memory_space<semaphore_mem>> -> memref<!tpu.dma_semaphore, #tpu.memory_space<semaphore_mem>>
    tpu.wait_dma2 semaphore(%130 : memref<!tpu.dma_semaphore, #tpu.memory_space<semaphore_mem>>) src(%127 : memref<1x128xf32, #tpu.memory_space<any>>) dst(%128 : memref<1x128xf32, #tpu.memory_space<vmem>>)
    %c0 = arith.constant 0 : index
    %c0_89 = arith.constant 0 : index
    %131 = vector.load %arg10[%c0, %c0_89] : memref<8x128xf32, #tpu.memory_space<vmem>>, vector<8x128xf32>
    %132 = arith.truncf %131 : vector<8x128xf32> to vector<8x128xbf16>
    %c0_90 = arith.constant 0 : index
    %c0_91 = arith.constant 0 : index
    %133 = vector.load %arg5[%c0_90, %c0_91] : memref<128x128xbf16, #tpu.memory_space<vmem>>, vector<128x128xbf16>
    %cst = arith.constant dense<0.000000e+00> : vector<8x128xf32>
    %134 = tpu.matmul %132, %133, %cst {dimension_numbers = #tpu.dot_dimension_numbers<[1], [0], [0], [1], [0, 0, 1, 1], [], []>} : vector<8x128xbf16>, vector<128x128xbf16>, vector<8x128xf32> -> vector<8x128xf32>
    %c0_92 = arith.constant 0 : index
    %c0_93 = arith.constant 0 : index
    %135 = vector.load %arg6[%c0_92, %c0_93] : memref<1x128xf32, #tpu.memory_space<vmem>>, vector<1x128xf32>
    %136 = vector.broadcast %135 : vector<1x128xf32> to vector<8x128xf32>
    %137 = arith.addf %134, %136 : vector<8x128xf32>
    %138 = math.tanh %137 : vector<8x128xf32>
    %139 = arith.truncf %138 : vector<8x128xf32> to vector<8x128xbf16>
    %c0_94 = arith.constant 0 : index
    %c0_95 = arith.constant 0 : index
    %140 = vector.load %arg12[%c0_94, %c0_95] : memref<128x128xf32, #tpu.memory_space<vmem>>, vector<128x128xf32>
    %141 = arith.truncf %140 : vector<128x128xf32> to vector<128x128xbf16>
    %cst_96 = arith.constant dense<0.000000e+00> : vector<8x128xf32>
    %142 = tpu.matmul %139, %141, %cst_96 {dimension_numbers = #tpu.dot_dimension_numbers<[1], [1], [0], [0], [0, 0, 1, 0], [], []>} : vector<8x128xbf16>, vector<128x128xbf16>, vector<8x128xf32> -> vector<8x128xf32>
    %c0_97 = arith.constant 0 : index
    %c0_98 = arith.constant 0 : index
    %143 = vector.load %arg9[%c0_97, %c0_98] : memref<8x128xf32, #tpu.memory_space<vmem>>, vector<8x128xf32>
    tpu.vector_store %arg9[%c0_97, %c0_98], %142 {strides = array<i32>} : memref<8x128xf32, #tpu.memory_space<vmem>>, vector<8x128xf32>,
    return
  }
  func.func @transform_2(%arg0: i32, %arg1: memref<8xi32, #tpu.memory_space<smem>>, %arg2: memref<4xi32, #tpu.memory_space<smem>>) -> (i32, i32) {
    %c0_i32 = arith.constant 0 : i32
    %c0_i32_0 = arith.constant 0 : i32
    %c0_i32_1 = arith.constant 0 : i32
    return %c0_i32, %c0_i32_0 : i32, i32
  }
  func.func @transform_3(%arg0: i32, %arg1: memref<8xi32, #tpu.memory_space<smem>>, %arg2: memref<4xi32, #tpu.memory_space<smem>>) -> (i32, i32) {
    %c0_i32 = arith.constant 0 : i32
    %c0_i32_0 = arith.constant 0 : i32
    %c0_i32_1 = arith.constant 0 : i32
    return %c0_i32, %c0_i32_0 : i32, i32
  }
  func.func @transform_4(%arg0: i32, %arg1: memref<8xi32, #tpu.memory_space<smem>>, %arg2: memref<4xi32, #tpu.memory_space<smem>>) -> (i32, i32) {
    %c0_i32 = arith.constant 0 : i32
    %c0_i32_0 = arith.constant 0 : i32
    %c0_i32_1 = arith.constant 0 : i32
    return %c0_i32, %c0_i32_0 : i32, i32
  }
  func.func @transform_5(%arg0: i32, %arg1: memref<8xi32, #tpu.memory_space<smem>>, %arg2: memref<4xi32, #tpu.memory_space<smem>>) -> (i32, i32) {
    %c0_i32 = arith.constant 0 : i32
    %c0_i32_0 = arith.constant 0 : i32
    %c0_i32_1 = arith.constant 0 : i32
    return %c0_i32, %c0_i32_0 : i32, i32
  }
  func.func @transform_6(%arg0: i32, %arg1: memref<8xi32, #tpu.memory_space<smem>>, %arg2: memref<4xi32, #tpu.memory_space<smem>>) -> (i32, i32) {
    %c0_i32 = arith.constant 0 : i32
    %c0_i32_0 = arith.constant 0 : i32
    return %arg0, %c0_i32 : i32, i32
  }
}

</mosaic_0001>

<bundles_post_ra>
// kernel: contrastive_critic_forward.1
= control target key start
LH: loop header
LB: loop body
LE: loop exit
PB: predicated region body
PF: predicated region fallthrough
CT: control target
= control target key end

     0   :  { %s1228_s11 = smov [#allocation8]   ;;  %s1229_s12 = smov [#allocation9]   ;;  %s1441_s0 = inlined_call_operand.vmem [shape: s32[8], index: 0, kind: input, shape index: {}]   ;;  %s1442_s2 = inlined_call_operand.vmem [shape: f32[8,8,128], index: 2, kind: input, shape index: {}]   ;;  %s1443_s3 = inlined_call_operand.vmem [shape: f32[4,8,128], index: 3, kind: input, shape index: {}]   ;;  %s1444_s4 = inlined_call_operand.vmem [shape: bf16[128,128], index: 4, kind: input, shape index: {}]   ;;  %s1445_s5 = inlined_call_operand.vmem [shape: f32[1,128], index: 5, kind: input, shape index: {}]   ;;  %s1446_s6 = inlined_call_operand.vmem [shape: bf16[128,128], index: 6, kind: input, shape index: {}]   ;;  %s1447_s7 = inlined_call_operand.vmem [shape: f32[1,128], index: 7, kind: input, shape index: {}]   ;;  %s1448_s8 = inlined_call_operand.vmem [shape: f32[8,128], index: 8, kind: output, shape index: {}]   ;;  %s1449_s1 = inlined_call_operand.vmem [shape: s32[4], index: 1, kind: input, shape index: {}]  }
   0x1   :  { %s14_s29 = sshll.u32 %s1441_s0, 4  ;;  %s19_s10 = sshll.u32 %s1449_s1, 4  ;;  %s15_s29 = int_to_ptr.vmem [resolvable:$true] %s14_s29  ;;  %s20_s10 = int_to_ptr.vmem [resolvable:$true] %s19_s10 }
   0x2   :  { %17 = dma.vmem_to_smem %s15_s29, 16, %s1228_s11, [#allocation7] }
   0x3   :  { %22 = dma.vmem_to_smem %s20_s10, 16, %s1229_s12, [#allocation7] }
   0x4   :  { %1202 = dma.done.wait [#allocation7], 32 }
   0x5   :  { %1203 = vsyncadd [#allocation7], 4294967264 }
   0x6   :  { %25 = sfence }
   0x7   :  { %s1011_s13 = sld [smem:[#allocation9 + $0x1]]  ;;  %v1230_v0 = vmov 0.0  }
   0x8   :  { %38 = vst [vmem:[#allocation3] sm:$0xff] %v1230_v0  ;;  %s1012_s14 = sld [smem:[#allocation9 + $0x2]] }
   0x9   :  { %39 = vst [vmem:[#allocation3 + $0x8] sm:$0xff] %v1230_v0  ;;  %s1282_s15 = sld [smem:[#allocation9 + $0x3]] }
   0xa   :  { %40 = vst [vmem:[#allocation3 + $0x10] sm:$0xff] %v1230_v0  ;;  %s54_s0 = sld [smem:[#allocation9]] }
   0xb   :  { %41 = vst [vmem:[#allocation3 + $0x18] sm:$0xff] %v1230_v0 }
   0xc   :  { %42 = vst [vmem:[#allocation3 + $0x20] sm:$0xff] %v1230_v0 }
   0xd   :  { %43 = vst [vmem:[#allocation3 + $0x28] sm:$0xff] %v1230_v0 }
   0xe   :  { %44 = vst [vmem:[#allocation3 + $0x30] sm:$0xff] %v1230_v0 }
   0xf   :  { %45 = vst [vmem:[#allocation3 + $0x38] sm:$0xff] %v1230_v0 }
  0x10   :  { %46 = vst [vmem:[#allocation3 + $0x40] sm:$0xff] %v1230_v0  ;;  %s58_s17 = scalar_lea.vmem %s1443_s3, %s54_s0 }
  0x11   :  { %47 = vst [vmem:[#allocation3 + $0x48] sm:$0xff] %v1230_v0  ;;  %v73_v1 = vld [vmem:[%s58_s17] sm:$0x1] }
  0x12   :  { %48 = vst [vmem:[#allocation3 + $0x50] sm:$0xff] %v1230_v0 }
  0x13   :  { %49 = vst [vmem:[#allocation3 + $0x58] sm:$0xff] %v1230_v0 }
  0x14   :  { %50 = vst [vmem:[#allocation3 + $0x60] sm:$0xff] %v1230_v0 }
  0x15   :  { %51 = vst [vmem:[#allocation3 + $0x68] sm:$0xff] %v1230_v0 }
  0x16   :  { %52 = vst [vmem:[#allocation3 + $0x70] sm:$0xff] %v1230_v0 }
  0x17   :  { %53 = vst [vmem:[#allocation3 + $0x78] sm:$0xff] %v1230_v0 }
  0x18   :  { %74 = vst [vmem:[#allocation3] sm:$0x1] %v73_v1 }
  0x19   :  { %92 = vsyncadd [#allocation6], 16  ;;  %s942_s20 = scalar_lea.vmem %s1443_s3, %s1011_s13 }
  0x1a   :  { %v1014_v2 = vld [vmem:[%s942_s20 + $0x8] sm:$0x1] }
  0x1b   :  { %112 = vst [vmem:[#allocation3 + $0x1] sm:$0x1] %v1014_v2 }
  0x1c   :  { %130 = vsyncadd [#allocation6 + $0x1], 16  ;;  %s944_s23 = scalar_lea.vmem %s1443_s3, %s1012_s14 }
  0x1d   :  { %v1015_v3 = vld [vmem:[%s944_s23 + $0x10] sm:$0x1] }
  0x1e   :  { %150 = vst [vmem:[#allocation3 + $0x2] sm:$0x1] %v1015_v3 }
  0x1f   :  { %168 = vsyncadd [#allocation6 + $0x2], 16  ;;  %s946_s26 = scalar_lea.vmem %s1443_s3, %s1282_s15 }
  0x20   :  { %v1016_v4 = vld [vmem:[%s946_s26 + $0x18] sm:$0x1] }
  0x21   :  { %188 = vst [vmem:[#allocation3 + $0x3] sm:$0x1] %v1016_v4 }
  0x22   :  { %206 = vsyncadd [#allocation6 + $0x3], 16 }
  0x23   :  { %1204 = dma.done.wait [#allocation6], 16 }
  0x24   :  { %1205 = vsyncadd [#allocation6], 4294967280 }
  0x25   :  { %1206 = dma.done.wait [#allocation6 + $0x1], 16 }
  0x26   :  { %1207 = vsyncadd [#allocation6 + $0x1], 4294967280 }
  0x27   :  { %1208 = dma.done.wait [#allocation6 + $0x2], 16 }
  0x28   :  { %1209 = vsyncadd [#allocation6 + $0x2], 4294967280 }
  0x29   :  { %1210 = dma.done.wait [#allocation6 + $0x3], 16 }
  0x2a   :  { %1211 = vsyncadd [#allocation6 + $0x3], 4294967280  ;;  %s390_s27 = sld [smem:[#allocation8]]  ;;  %v1114_v5 = vld [vmem:[%s1446_s6 + $0x38] sm:$0xff]  ;;  %v1113_v7 = vld [vmem:[%s1446_s6 + $0x30] sm:$0xff] }
  0x2b   :  { %s1297_s28 = sld [smem:[#allocation8 + $0x1]]  ;;  %308 = vmatpush.bf16.msra.mxu0 %v1114_v5  ;;  %1124 = vmatpush.bf16.msra.mxu3 %v1114_v5  ;;  %v1112_v8 = vld [vmem:[%s1446_s6 + $0x28] sm:$0xff]  ;;  %v1111_v9 = vld [vmem:[%s1446_s6 + $0x20] sm:$0xff]  ;;  %v1110_v10 = vld [vmem:[%s1446_s6 + $0x18] sm:$0xff] }
  0x2c   :  { %s1299_s29 = sld [smem:[#allocation8 + $0x2]]  ;;  %1123 = vmatpush.bf16.msra.mxu1 %v1114_v5  ;;  %v1109_v11 = vld [vmem:[%s1446_s6 + $0x10] sm:$0xff]  ;;  %v1108_v12 = vld [vmem:[%s1446_s6 + $0x8] sm:$0xff]  ;;  %v1107_v13 = vld [vmem:[%s1446_s6] sm:$0xff] }
  0x2d   :  { %s1301_s30 = sld [smem:[#allocation8 + $0x3]]  ;;  %v216_v14 = vld [vmem:[#allocation3] sm:$0xff]  ;;  %v217_v15 = vld [vmem:[#allocation3 + $0x8] sm:$0xff]  ;;  %v226_v16 = vld [vmem:[#allocation3 + $0x50] sm:$0xff] }
  0x2e   :  { %s1303_s9 = sld [smem:[#allocation8 + $0x4]]  ;;  %v227_v17 = vld [vmem:[#allocation3 + $0x58] sm:$0xff]  ;;  %v222_v18 = vld [vmem:[#allocation3 + $0x30] sm:$0xff]  ;;  %v232_v20 = vpack.c.bf16 %v217_v15, %v216_v14  ;;  %v228_v25 = vld [vmem:[#allocation3 + $0x60] sm:$0xff] }
  0x2f   :  { %s1305_s3 = sld [smem:[#allocation8 + $0x5]]  ;;  %309 = vmatpush.bf16.msra.mxu0 %v1113_v7  ;;  %1126 = vmatpush.bf16.msra.mxu3 %v1113_v7  ;;  %v223_v19 = vld [vmem:[#allocation3 + $0x38] sm:$0xff]  ;;  %v237_v21 = vpack.c.bf16 %v227_v17, %v226_v16  ;;  %v218_v23 = vld [vmem:[#allocation3 + $0x10] sm:$0xff]  ;;  %v229_v26 = vld [vmem:[#allocation3 + $0x68] sm:$0xff] }
  0x30   :  { %s1307_s10 = sld [smem:[#allocation8 + $0x6]]  ;;  %s407_s13 = scalar_lea.vmem %s1442_s2, %s390_s27  ;;  %1125 = vmatpush.bf16.msra.mxu1 %v1113_v7  ;;  %v235_v22 = vpack.c.bf16 %v223_v19, %v222_v18  ;;  %v219_v24 = vld [vmem:[#allocation3 + $0x18] sm:$0xff]  ;;  %v224_v27 = vld [vmem:[#allocation3 + $0x40] sm:$0xff]  ;;  %v225_v28 = vld [vmem:[#allocation3 + $0x48] sm:$0xff]  ;;  %v238_v30 = vpack.c.bf16 %v229_v26, %v228_v25 }
  0x31   :  { %s1315_s0 = sld [smem:[#allocation8 + $0x7]]  ;;  %v422_v6 = vld [vmem:[%s407_s13] sm:$0x1]  ;;  %v233_v29 = vpack.c.bf16 %v219_v24, %v218_v23  ;;  %v236_v31 = vpack.c.bf16 %v225_v28, %v224_v27  ;;  %v220_v32 = vld [vmem:[#allocation3 + $0x20] sm:$0xff]  ;;  %v221_v33 = vld [vmem:[#allocation3 + $0x28] sm:$0xff] }
  0x32   :  { %423 = vst [vmem:[#allocation2] sm:$0x1] %v422_v6  ;;  %v230_v34 = vld [vmem:[#allocation3 + $0x70] sm:$0xff]  ;;  %v231_v35 = vld [vmem:[#allocation3 + $0x78] sm:$0xff]  ;;  %v234_v36 = vpack.c.bf16 %v221_v33, %v220_v32 }
  0x33   :  { %310 = vmatpush.bf16.msra.mxu0 %v1112_v8  ;;  %1128 = vmatpush.bf16.msra.mxu3 %v1112_v8  ;;  %v239_v37 = vpack.c.bf16 %v231_v35, %v230_v34  ;;  %v1142_v38 = vld [vmem:[%s1447_s7] ss:$0 sm:$0xff] }
  0x34   :  { %1127 = vmatpush.bf16.msra.mxu1 %v1112_v8 }
  0x37   :  { %311 = vmatpush.bf16.msra.mxu0 %v1111_v9  ;;  %1130 = vmatpush.bf16.msra.mxu3 %v1111_v9 }
  0x38   :  { %1129 = vmatpush.bf16.msra.mxu1 %v1111_v9 }
  0x3b   :  { %312 = vmatpush.bf16.msra.mxu0 %v1110_v10  ;;  %1132 = vmatpush.bf16.msra.mxu3 %v1110_v10 }
  0x3c   :  { %1131 = vmatpush.bf16.msra.mxu1 %v1110_v10 }
  0x3f   :  { %313 = vmatpush.bf16.msra.mxu0 %v1109_v11  ;;  %1134 = vmatpush.bf16.msra.mxu3 %v1109_v11 }
  0x40   :  { %1133 = vmatpush.bf16.msra.mxu1 %v1109_v11 }
  0x43   :  { %314 = vmatpush.bf16.msra.mxu0 %v1108_v12  ;;  %1136 = vmatpush.bf16.msra.mxu3 %v1108_v12 }
  0x44   :  { %1135 = vmatpush.bf16.msra.mxu1 %v1108_v12 }
  0x47   :  { %315 = vmatpush.bf16.msra.mxu0 %v1107_v13  ;;  %1138 = vmatpush.bf16.msra.mxu3 %v1107_v13 }
  0x48   :  { %1137 = vmatpush.bf16.msra.mxu1 %v1107_v13 }
  0x4a   :  { %316 = vmatmul.bf16.vlgmr.msra.gmra.mxu0 %v232_v20  ;;  %341 = vmatmul.bf16.vlgmr.msra.gmra.mxu3 %v237_v21 }
  0x4b   :  { %331 = vmatmul.bf16.vlgmr.msra.gmra.mxu1 %v235_v22 }
  0x5a   :  { %321 = vmatmul.bf16.gmra.mxu0 %v233_v29  ;;  %346 = vmatmul.bf16.gmra.mxu3 %v238_v30 }
  0x5b   :  { %336 = vmatmul.bf16.gmra.mxu1 %v236_v31 }
  0x6a   :  { %326 = vmatmul.bf16.gmra.mxu0 %v234_v36  ;;  %351 = vmatmul.bf16.gmra.mxu3 %v239_v37 }
  0xc7   :  { %v317_v39 = vpop.f32.mrf.mxu0 }
  0xc8   :  { %v318_v40 = vadd.f32 %v1142_v38, %v317_v39  ;;  %v332_v41 = vpop.f32.mrf.mxu1 }
  0xc9   :  { %v333_v42 = vadd.f32 %v1142_v38, %v332_v41 }
  0xca   :  { %1143 = vtanh.f32 %v318_v40 }
  0xcb   :  { %1145 = vtanh.f32 %v333_v42 }
  0xcd   :  { %v342_v43 = vpop.f32.mrf.mxu3 }
  0xce   :  { %v343_v44 = vadd.f32 %v1142_v38, %v342_v43 }
  0xcf   :  { %v319_v45 = vpop.f32.mrf.mxu0 }
  0xd0   :  { %v1341_v46 = vpop.eup %1143  ;;  %1147 = vtanh.f32 %v343_v44  ;;  %v320_v47 = vadd.f32 %v1142_v38, %v319_v45  ;;  %v334_v48 = vpop.f32.mrf.mxu1 }
  0xd1   :  { %v1343_v49 = vpop.eup %1145  ;;  %v335_v50 = vadd.f32 %v1142_v38, %v334_v48 }
  0xd2   :  { %1149 = vtanh.f32 %v320_v47 }
  0xd3   :  { %1151 = vtanh.f32 %v335_v50 }
  0xd5   :  { %v344_v51 = vpop.f32.mrf.mxu3 }
  0xd6   :  { %v1345_v52 = vpop.eup %1147  ;;  %v345_v53 = vadd.f32 %v1142_v38, %v344_v51 }
  0xd7   :  { %v322_v54 = vpop.f32.mrf.mxu0 }
  0xd8   :  { %v1347_v55 = vpop.eup %1149  ;;  %1153 = vtanh.f32 %v345_v53  ;;  %v323_v56 = vadd.f32 %v1142_v38, %v322_v54  ;;  %v337_v57 = vpop.f32.mrf.mxu1 }
  0xd9   :  { %v1349_v58 = vpop.eup %1151  ;;  %v338_v59 = vadd.f32 %v1142_v38, %v337_v57 }
  0xda   :  { %1155 = vtanh.f32 %v323_v56 }
  0xdb   :  { %1157 = vtanh.f32 %v338_v59 }
  0xdd   :  { %v347_v60 = vpop.f32.mrf.mxu3 }
  0xde   :  { %v1351_v61 = vpop.eup %1153  ;;  %v348_v62 = vadd.f32 %v1142_v38, %v347_v60 }
  0xdf   :  { %v324_v63 = vpop.f32.mrf.mxu0 }
  0xe0   :  { %v1353_v0 = vpop.eup %1155  ;;  %1159 = vtanh.f32 %v348_v62  ;;  %v325_v1 = vadd.f32 %v1142_v38, %v324_v63  ;;  %v339_v2 = vpop.f32.mrf.mxu1 }
  0xe1   :  { %v1355_v3 = vpop.eup %1157  ;;  %v340_v4 = vadd.f32 %v1142_v38, %v339_v2 }
  0xe2   :  { %1161 = vtanh.f32 %v325_v1 }
  0xe3   :  { %1163 = vtanh.f32 %v340_v4 }
  0xe5   :  { %v349_v5 = vpop.f32.mrf.mxu3 }
  0xe6   :  { %v1357_v6 = vpop.eup %1159  ;;  %v350_v7 = vadd.f32 %v1142_v38, %v349_v5 }
  0xe7   :  { %v327_v8 = vpop.f32.mrf.mxu0 }
  0xe8   :  { %v1359_v9 = vpop.eup %1161  ;;  %1165 = vtanh.f32 %v350_v7  ;;  %v328_v10 = vadd.f32 %v1142_v38, %v327_v8 }
  0xe9   :  { %v1361_v11 = vpop.eup %1163 }
  0xea   :  { %1167 = vtanh.f32 %v328_v10 }
  0xed   :  { %v352_v12 = vpop.f32.mrf.mxu3 }
  0xee   :  { %v1363_v13 = vpop.eup %1165  ;;  %v353_v14 = vadd.f32 %v1142_v38, %v352_v12 }
  0xef   :  { %v329_v15 = vpop.f32.mrf.mxu0 }
  0xf0   :  { %v1365_v16 = vpop.eup %1167  ;;  %1169 = vtanh.f32 %v353_v14  ;;  %v330_v17 = vadd.f32 %v1142_v38, %v329_v15 }
  0xf2   :  { %1171 = vtanh.f32 %v330_v17 }
  0xf5   :  { %v354_v18 = vpop.f32.mrf.mxu3 }
  0xf6   :  { %v1170_v19 = vpop.eup %1169  ;;  %v355_v20 = vadd.f32 %v1142_v38, %v354_v18 }
  0xf8   :  { %v1367_v21 = vpop.eup %1171  ;;  %1173 = vtanh.f32 %v355_v20 }
  0xfe   :  { %v1174_v22 = vpop.eup %1173 }
  0xff   :  { %441 = vsyncadd [#allocation5], 16  ;;  %s949_s14 = scalar_lea.vmem %s1442_s2, %s1297_s28 }
 0x100   :  { %v1056_v23 = vld [vmem:[%s949_s14 + $0x8] sm:$0x1] }
 0x101   :  { %462 = vst [vmem:[#allocation2 + $0x1] sm:$0x1] %v1056_v23 }
 0x102   :  { %480 = vsyncadd [#allocation5 + $0x1], 16  ;;  %s951_s16 = scalar_lea.vmem %s1442_s2, %s1299_s29 }
 0x103   :  { %v1057_v24 = vld [vmem:[%s951_s16 + $0x10] sm:$0x1] }
 0x104   :  { %501 = vst [vmem:[#allocation2 + $0x2] sm:$0x1] %v1057_v24 }
 0x105   :  { %519 = vsyncadd [#allocation5 + $0x2], 16  ;;  %s953_s19 = scalar_lea.vmem %s1442_s2, %s1301_s30 }
 0x106   :  { %v1058_v25 = vld [vmem:[%s953_s19 + $0x18] sm:$0x1] }
 0x107   :  { %540 = vst [vmem:[#allocation2 + $0x3] sm:$0x1] %v1058_v25 }
 0x108   :  { %558 = vsyncadd [#allocation5 + $0x3], 16  ;;  %s955_s21 = scalar_lea.vmem %s1442_s2, %s1303_s9 }
 0x109   :  { %v1059_v26 = vld [vmem:[%s955_s21 + $0x20] sm:$0x1] }
 0x10a   :  { %579 = vst [vmem:[#allocation2 + $0x4] sm:$0x1] %v1059_v26 }
 0x10b   :  { %597 = vsyncadd [#allocation5 + $0x4], 16  ;;  %s957_s23 = scalar_lea.vmem %s1442_s2, %s1305_s3 }
 0x10c   :  { %v1060_v27 = vld [vmem:[%s957_s23 + $0x28] sm:$0x1] }
 0x10d   :  { %618 = vst [vmem:[#allocation2 + $0x5] sm:$0x1] %v1060_v27 }
 0x10e   :  { %636 = vsyncadd [#allocation5 + $0x5], 16  ;;  %s959_s25 = scalar_lea.vmem %s1442_s2, %s1307_s10 }
 0x10f   :  { %v1061_v28 = vld [vmem:[%s959_s25 + $0x30] sm:$0x1] }
 0x110   :  { %657 = vst [vmem:[#allocation2 + $0x6] sm:$0x1] %v1061_v28 }
 0x111   :  { %675 = vsyncadd [#allocation5 + $0x6], 16  ;;  %s961_s27 = scalar_lea.vmem %s1442_s2, %s1315_s0 }
 0x112   :  { %v1062_v29 = vld [vmem:[%s961_s27 + $0x38] sm:$0x1] }
 0x113   :  { %696 = vst [vmem:[#allocation2 + $0x7] sm:$0x1] %v1062_v29 }
 0x114   :  { %714 = vsyncadd [#allocation5 + $0x7], 16 }
 0x115   :  { %1212 = dma.done.wait [#allocation5], 16 }
 0x116   :  { %1213 = vsyncadd [#allocation5], 4294967280 }
 0x117   :  { %1214 = dma.done.wait [#allocation5 + $0x1], 16 }
 0x118   :  { %1215 = vsyncadd [#allocation5 + $0x1], 4294967280 }
 0x119   :  { %1216 = dma.done.wait [#allocation5 + $0x2], 16 }
 0x11a   :  { %1217 = vsyncadd [#allocation5 + $0x2], 4294967280 }
 0x11b   :  { %1218 = dma.done.wait [#allocation5 + $0x3], 16 }
 0x11c   :  { %1219 = vsyncadd [#allocation5 + $0x3], 4294967280 }
 0x11d   :  { %1220 = dma.done.wait [#allocation5 + $0x4], 16 }
 0x11e   :  { %1221 = vsyncadd [#allocation5 + $0x4], 4294967280 }
 0x11f   :  { %1222 = dma.done.wait [#allocation5 + $0x5], 16 }
 0x120   :  { %1223 = vsyncadd [#allocation5 + $0x5], 4294967280 }
 0x121   :  { %1224 = dma.done.wait [#allocation5 + $0x6], 16 }
 0x122   :  { %1225 = vsyncadd [#allocation5 + $0x6], 4294967280 }
 0x123   :  { %1226 = dma.done.wait [#allocation5 + $0x7], 16 }
 0x124   :  { %1227 = vsyncadd [#allocation5 + $0x7], 4294967280  ;;  %v1122_v30 = vld [vmem:[%s1444_s4 + $0x38] sm:$0xff]  ;;  %v840_v31 = vpack.c.bf16 %v1174_v22, %v1170_v19  ;;  %v1121_v32 = vld [vmem:[%s1444_s4 + $0x30] sm:$0xff]  ;;  %v839_v34 = vpack.c.bf16 %v1363_v13, %v1357_v6  ;;  %v838_v37 = vpack.c.bf16 %v1351_v61, %v1345_v52  ;;  %v837_v40 = vpack.c.bf16 %v1361_v11, %v1355_v3 }
 0x125   :  { %802 = vmatpush.bf16.msrb.mxu1 %v1122_v30  ;;  %v1120_v33 = vld [vmem:[%s1444_s4 + $0x28] sm:$0xff]  ;;  %v1119_v35 = vld [vmem:[%s1444_s4 + $0x20] sm:$0xff]  ;;  %v1118_v36 = vld [vmem:[%s1444_s4 + $0x18] sm:$0xff]  ;;  %v836_v44 = vpack.c.bf16 %v1349_v58, %v1343_v49  ;;  %v835_v45 = vpack.c.bf16 %v1367_v21, %v1365_v16  ;;  %v834_v47 = vpack.c.bf16 %v1359_v9, %v1353_v0  ;;  %v833_v48 = vpack.c.bf16 %v1347_v55, %v1341_v46 }
 0x126   :  { %841 = vmatpush.bf16.xpose.msra.mxu2 %v840_v31  ;;  %v1117_v38 = vld [vmem:[%s1444_s4 + $0x10] sm:$0xff]  ;;  %v1116_v39 = vld [vmem:[%s1444_s4 + $0x8] sm:$0xff]  ;;  %v1115_v41 = vld [vmem:[%s1444_s4] sm:$0xff] }
 0x127   :  { %v732_v42 = vld [vmem:[#allocation2] sm:$0xff] }
 0x128   :  { %v733_v43 = vpack.c.bf16 %v732_v42, %v732_v42  ;;  %v1175_v50 = vld [vmem:[%s1445_s5] ss:$0 sm:$0xff] }
 0x129   :  { %803 = vmatpush.bf16.msrb.mxu1 %v1121_v32 }
 0x12d   :  { %804 = vmatpush.bf16.msrb.mxu1 %v1120_v33 }
 0x12e   :  { %842 = vmatpush.bf16.xpose.msra.mxu2 %v839_v34 }
 0x131   :  { %805 = vmatpush.bf16.msrb.mxu1 %v1119_v35 }
 0x135   :  { %806 = vmatpush.bf16.msrb.mxu1 %v1118_v36 }
 0x136   :  { %843 = vmatpush.bf16.xpose.msra.mxu2 %v838_v37 }
 0x139   :  { %807 = vmatpush.bf16.msrb.mxu1 %v1117_v38 }
 0x13d   :  { %808 = vmatpush.bf16.msrb.mxu1 %v1116_v39 }
 0x13e   :  { %844 = vmatpush.bf16.xpose.msra.mxu2 %v837_v40 }
 0x141   :  { %809 = vmatpush.bf16.msrb.mxu1 %v1115_v41 }
 0x144   :  { %810 = vmatmul.bf16.vlgmr.msrb.gmra.mxu1 %v733_v43 }
 0x146   :  { %845 = vmatpush.bf16.xpose.msra.mxu2 %v836_v44 }
 0x14e   :  { %846 = vmatpush.bf16.xpose.msra.mxu2 %v835_v45 }
 0x156   :  { %847 = vmatpush.bf16.xpose.msra.mxu2 %v834_v47 }
 0x15e   :  { %848 = vmatpush.bf16.xpose.msra.mxu2 %v833_v48 }
 0x1c1   :  { %v811_v51 = vpop.f32.mrf.mxu1 }
 0x1c2   :  { %v812_v49 = vadd.f32 %v1175_v50, %v811_v51 }
 0x1c4   :  { %1176 = vtanh.f32 %v812_v49 }
 0x1c9   :  { %v813_v52 = vpop.f32.mrf.mxu1 }
 0x1ca   :  { %v1177_v53 = vpop.eup %1176 }
 0x1cb   :  { %v816_v54 = vpack.c.bf16 %v1177_v53, %v1177_v53 }
 0x1cd   :  { %849 = vmatmul.bf16.vlgmr.msra.gmra.mxu2 %v816_v54 }
 0x250   :  { %v850_v56 = vpop.f32.mrf.mxu2 }
 0x251   :  { %854 = vst [vmem:[%s1448_s8] sm:$0xff] %v850_v56 }
 0x258   :  { %v852_v57 = vpop.f32.mrf.mxu2 }
 0x259   :  { %859 = vsyncmov [#allocation5] }
 0x25c   :  { %s860_s29 = vpop.sfrf %859 }
 0x25d   :  { %p1095_p0 = scmp.ne.s32.totalorder %s860_s29, 0 }
 0x25f   :  { %864 = shalt.err (%p1095_p0)  }
 0x260   :  { %866 = vsyncmov [#allocation5 + $0x1] }
 0x263   :  { %s867_s22 = vpop.sfrf %866 }
 0x264   :  { %p1096_p1 = scmp.ne.s32.totalorder %s867_s22, 0 }
 0x266   :  { %871 = shalt.err (%p1096_p1)  }
 0x267   :  { %873 = vsyncmov [#allocation5 + $0x2] }
 0x26a   :  { %s874_s5 = vpop.sfrf %873 }
 0x26b   :  { %p1097_p2 = scmp.ne.s32.totalorder %s874_s5, 0 }
 0x26d   :  { %878 = shalt.err (%p1097_p2)  }
 0x26e   :  { %880 = vsyncmov [#allocation5 + $0x3] }
 0x271   :  { %s881_s23 = vpop.sfrf %880 }
 0x272   :  { %p1098_p3 = scmp.ne.s32.totalorder %s881_s23, 0 }
 0x274   :  { %885 = shalt.err (%p1098_p3)  }
 0x275   :  { %887 = vsyncmov [#allocation5 + $0x4] }
 0x278   :  { %s888_s30 = vpop.sfrf %887 }
 0x279   :  { %p1099_p4 = scmp.ne.s32.totalorder %s888_s30, 0 }
 0x27b   :  { %892 = shalt.err (%p1099_p4)  }
 0x27c   :  { %894 = vsyncmov [#allocation5 + $0x5] }
 0x27f   :  { %s895_s8 = vpop.sfrf %894 }
 0x280   :  { %p1100_p5 = scmp.ne.s32.totalorder %s895_s8, 0 }
 0x282   :  { %899 = shalt.err (%p1100_p5)  }
 0x283   :  { %901 = vsyncmov [#allocation5 + $0x6] }
 0x286   :  { %s902_s24 = vpop.sfrf %901 }
 0x287   :  { %p1101_p6 = scmp.ne.s32.totalorder %s902_s24, 0 }
 0x289   :  { %906 = shalt.err (%p1101_p6)  }
 0x28a   :  { %908 = vsyncmov [#allocation5 + $0x7] }
 0x28d   :  { %s909_s25 = vpop.sfrf %908 }
 0x28e   :  { %p1102_p7 = scmp.ne.s32.totalorder %s909_s25, 0 }
 0x290   :  { %913 = shalt.err (%p1102_p7)  }
 0x291   :  { %914 = vsyncmov [#allocation6] }
 0x294   :  { %s915_s9 = vpop.sfrf %914 }
 0x295   :  { %p1103_p8 = scmp.ne.s32.totalorder %s915_s9, 0 }
 0x297   :  { %919 = shalt.err (%p1103_p8)  }
 0x298   :  { %921 = vsyncmov [#allocation6 + $0x1] }
 0x29b   :  { %s922_s26 = vpop.sfrf %921 }
 0x29c   :  { %p1104_p9 = scmp.ne.s32.totalorder %s922_s26, 0 }
 0x29e   :  { %926 = shalt.err (%p1104_p9)  }
 0x29f   :  { %928 = vsyncmov [#allocation6 + $0x2] }
 0x2a2   :  { %s929_s27 = vpop.sfrf %928 }
 0x2a3   :  { %p1105_p10 = scmp.ne.s32.totalorder %s929_s27, 0 }
 0x2a5   :  { %933 = shalt.err (%p1105_p10)  }
 0x2a6   :  { %935 = vsyncmov [#allocation6 + $0x3] }
 0x2a9   :  { %s936_s2 = vpop.sfrf %935 }
 0x2aa   :  { %p1106_p11 = scmp.ne.s32.totalorder %s936_s2, 0 }
 0x2ac   :  { %940 = shalt.err (%p1106_p11)  }

</bundles_post_ra>
